<compile_context>
chip_gen: v7x
topology: tpu7x:2x2x1
jax: 0.10.0
libtpu: 0.0.40
codegen_flags: <defaults>
</compile_context>

<pallas_src>
import jax
import jax.numpy as jnp
from jax.experimental import pallas as pl
from jax.experimental.pallas import tpu as pltpu

# Model dims (PyTorch spec).
K_IN = 784      # 28 * 28
H1 = 128
H2 = 256
N_OUT = 10

MAX_TB = 1024   # max batch-tile rows per grid step


def mlp_kernel(x_ref, w1_ref, b1_ref, w2_ref, b2_ref, w3_ref, b3_ref, o_ref):
    # x_ref: (TB, 784) f32; w* bf16; b* f32; o_ref: (TB, 10) f32.
    x = x_ref[...].astype(jnp.bfloat16)                                 # in-kernel cast (free)

    h1 = jnp.dot(x, w1_ref[...], preferred_element_type=jnp.float32) + b1_ref[...]
    h1 = jnp.maximum(h1, 0.0).astype(jnp.bfloat16)                      # relu(hidden_1st); dropout = id (eval)

    h2 = jnp.dot(h1, w2_ref[...], preferred_element_type=jnp.float32) + b2_ref[...]
    h2 = jnp.maximum(h2, 0.0).astype(jnp.bfloat16)                      # relu(hidden_2nd); dropout = id (eval)

    o_ref[...] = (jnp.dot(h2, w3_ref[...], preferred_element_type=jnp.float32)
                  + b3_ref[...])                                        # out(x), no activation


def _choose_tb(batch):
    """Pick the batch-tile size.

    - batch <= MAX_TB: single full-batch tile (full-extent block is always legal).
    - otherwise: tile of at most MAX_TB rows, multiple of 8, and <= ceil(B/2) so
      the grid has >= 2 steps (lets the 'parallel' axis shard across both TCs on v7x).
    """
    if batch <= MAX_TB:
        return batch
    half = (batch + 1) // 2
    tb = min(MAX_TB, ((half + 7) // 8) * 8)
    return tb


def prepare_params(params):
    """One-time preprocessing: cast MXU operands (weights) to bf16; biases stay f32."""
    w1, b1, w2, b2, w3, b3 = params
    return (w1.astype(jnp.bfloat16), b1.astype(jnp.float32),
            w2.astype(jnp.bfloat16), b2.astype(jnp.float32),
            w3.astype(jnp.bfloat16), b3.astype(jnp.float32))


def mnist_nn_forward(x_nchw, prepared_params):
    """x_nchw: (B, 1, 28, 28) float32. Returns logits (B, 10) float32."""
    w1, b1, w2, b2, w3, b3 = prepared_params
    B = x_nchw.shape[0]
    x2d = x_nchw.reshape(B, -1).astype(jnp.float32)      # x.view(x.size(0), -1); no copy

    TB = _choose_tb(B)
    grid = (pl.cdiv(B, TB),)

    grid_spec = pltpu.PrefetchScalarGridSpec(
        num_scalar_prefetch=0,
        grid=grid,
        in_specs=[
            pl.BlockSpec((TB, K_IN), lambda i: (i, 0)),     # x tile: pipelined over batch
            pl.BlockSpec((K_IN, H1), lambda i: (0, 0)),     # weights/biases: VMEM-resident
            pl.BlockSpec((1, H1), lambda i: (0, 0)),
            pl.BlockSpec((H1, H2), lambda i: (0, 0)),
            pl.BlockSpec((1, H2), lambda i: (0, 0)),
            pl.BlockSpec((H2, N_OUT), lambda i: (0, 0)),
            pl.BlockSpec((1, N_OUT), lambda i: (0, 0)),
        ],
        out_specs=pl.BlockSpec((TB, N_OUT), lambda i: (i, 0)),
    )

    out = pl.pallas_call(
        mlp_kernel,
        out_shape=jax.ShapeDtypeStruct((B, N_OUT), jnp.float32),
        grid_spec=grid_spec,
        compiler_params=pltpu.CompilerParams(
            dimension_semantics=("parallel",),        # shard batch tiles across TCs (v7x)
            vmem_limit_bytes=32 * 1024 * 1024,        # ~8 MiB footprint at TB=1024; fits all gens
        ),
    )(x2d, w1, b1, w2, b2, w3, b3)

    return out


def init_params(key):
    """Deterministic init mirroring the nn.Linear shapes.

    PyTorch stores Linear weight as (out, in); we keep the transposed (in, out)
    layout so the kernel does plain x @ W + b (same math as x @ W_pt.T + b).
    """
    def linear(k, fan_in, fan_out):
        kw, kb = jax.random.split(k)
        bound = 1.0 / jnp.sqrt(fan_in)
        w = jax.random.uniform(kw, (fan_in, fan_out), jnp.float32, -bound, bound)
        b = jax.random.uniform(kb, (1, fan_out), jnp.float32, -bound, bound)
        return w, b

    k1, k2, k3 = jax.random.split(key, 3)
    w1, b1 = linear(k1, K_IN, H1)    # hidden_1st
    w2, b2 = linear(k2, H1, H2)      # hidden_2nd
    w3, b3 = linear(k3, H2, N_OUT)   # out
    return (w1, b1, w2, b2, w3, b3)


if __name__ == "__main__":
    key = jax.random.PRNGKey(0)
    kx, kp = jax.random.split(key)

    B = 8
    x = jax.random.normal(kx, (B, 1, 28, 28), dtype=jnp.float32)  # NCHW, MNIST-like
    params = init_params(kp)
    prepared = prepare_params(params)                              # one-time weight cast

    logits = mnist_nn_forward(x, prepared)
    logits = jax.block_until_ready(logits)
    assert logits.shape == (B, 10)

    # Reference mirroring the kernel's bf16-operand / f32-accumulate scheme.
    w1, b1, w2, b2, w3, b3 = params
    x2d = x.reshape(B, -1)
    h1 = jnp.maximum(jnp.dot(x2d.astype(jnp.bfloat16), w1.astype(jnp.bfloat16),
                             preferred_element_type=jnp.float32) + b1, 0.0)
    h2 = jnp.maximum(jnp.dot(h1.astype(jnp.bfloat16), w2.astype(jnp.bfloat16),
                             preferred_element_type=jnp.float32) + b2, 0.0)
    ref = jnp.dot(h2.astype(jnp.bfloat16), w3.astype(jnp.bfloat16),
                  preferred_element_type=jnp.float32) + b3
    assert jnp.allclose(logits, ref, atol=2e-2, rtol=2e-2)

    # Loose sanity check against the pure-f32 math (bf16 operand rounding only).
    h1f = jnp.maximum(x2d @ w1 + b1, 0.0)
    h2f = jnp.maximum(h1f @ w2 + b2, 0.0)
    reff = h2f @ w3 + b3
    assert jnp.allclose(logits, reff, atol=1e-1, rtol=1e-1)

    print("KERNEL_OK")
</pallas_src>

<mosaic_0001>
module attributes {stable_mosaic.version = 11 : i64} {
  func.func @mlp_kernel(%arg0: i32, %arg1: memref<8x784xf32, #tpu.memory_space<vmem>>, %arg2: memref<784x128xbf16, #tpu.memory_space<vmem>>, %arg3: memref<1x128xf32, #tpu.memory_space<vmem>>, %arg4: memref<128x256xbf16, #tpu.memory_space<vmem>>, %arg5: memref<1x256xf32, #tpu.memory_space<vmem>>, %arg6: memref<256x10xbf16, #tpu.memory_space<vmem>>, %arg7: memref<1x10xf32, #tpu.memory_space<vmem>>, %arg8: memref<8x10xf32, #tpu.memory_space<vmem>>) attributes {dimension_semantics = [#tpu.dimension_semantics<parallel>], iteration_bounds = array<i64: 1>, scalar_prefetch = 0 : i64, scratch_operands = 0 : i64, tpu.core_type = #tpu.core_type<tc>, window_params = [{transform_indices = @transform_0, window_bounds = array<i64: 8, 784>}, {pipeline_mode = #tpu.pipeline_mode<synchronous>, transform_indices = @transform_1, window_bounds = array<i64: 784, 128>}, {pipeline_mode = #tpu.pipeline_mode<synchronous>, transform_indices = @transform_2, window_bounds = array<i64: 1, 128>}, {pipeline_mode = #tpu.pipeline_mode<synchronous>, transform_indices = @transform_3, window_bounds = array<i64: 128, 256>}, {pipeline_mode = #tpu.pipeline_mode<synchronous>, transform_indices = @transform_4, window_bounds = array<i64: 1, 256>}, {pipeline_mode = #tpu.pipeline_mode<synchronous>, transform_indices = @transform_5, window_bounds = array<i64: 256, 10>}, {pipeline_mode = #tpu.pipeline_mode<synchronous>, transform_indices = @transform_6, window_bounds = array<i64: 1, 10>}, {transform_indices = @transform_7, window_bounds = array<i64: 8, 10>}]} {
    %c0 = arith.constant 0 : index
    %c0_0 = arith.constant 0 : index
    %0 = vector.load %arg1[%c0, %c0_0] : memref<8x784xf32, #tpu.memory_space<vmem>>, vector<8x784xf32>
    %1 = arith.truncf %0 : vector<8x784xf32> to vector<8x784xbf16>
    %c0_1 = arith.constant 0 : index
    %c0_2 = arith.constant 0 : index
    %2 = vector.load %arg2[%c0_1, %c0_2] : memref<784x128xbf16, #tpu.memory_space<vmem>>, vector<784x128xbf16>
    %cst = arith.constant dense<0.000000e+00> : vector<8x128xf32>
    %3 = tpu.matmul %1, %2, %cst {dimension_numbers = #tpu.dot_dimension_numbers<[1], [0], [0], [1], [0, 0, 1, 1], [], []>} : vector<8x784xbf16>, vector<784x128xbf16>, vector<8x128xf32> -> vector<8x128xf32>
    %c0_3 = arith.constant 0 : index
    %c0_4 = arith.constant 0 : index
    %4 = vector.load %arg3[%c0_3, %c0_4] : memref<1x128xf32, #tpu.memory_space<vmem>>, vector<1x128xf32>
    %5 = vector.broadcast %4 : vector<1x128xf32> to vector<8x128xf32>
    %6 = arith.addf %3, %5 : vector<8x128xf32>
    %cst_5 = arith.constant 0.000000e+00 : f32
    %7 = vector.broadcast %cst_5 : f32 to vector<8x128xf32>
    %8 = arith.maximumf %6, %7 : vector<8x128xf32>
    %9 = arith.truncf %8 : vector<8x128xf32> to vector<8x128xbf16>
    %c0_6 = arith.constant 0 : index
    %c0_7 = arith.constant 0 : index
    %10 = vector.load %arg4[%c0_6, %c0_7] : memref<128x256xbf16, #tpu.memory_space<vmem>>, vector<128x256xbf16>
    %cst_8 = arith.constant dense<0.000000e+00> : vector<8x256xf32>
    %11 = tpu.matmul %9, %10, %cst_8 {dimension_numbers = #tpu.dot_dimension_numbers<[1], [0], [0], [1], [0, 0, 1, 1], [], []>} : vector<8x128xbf16>, vector<128x256xbf16>, vector<8x256xf32> -> vector<8x256xf32>
    %c0_9 = arith.constant 0 : index
    %c0_10 = arith.constant 0 : index
    %12 = vector.load %arg5[%c0_9, %c0_10] : memref<1x256xf32, #tpu.memory_space<vmem>>, vector<1x256xf32>
    %13 = vector.broadcast %12 : vector<1x256xf32> to vector<8x256xf32>
    %14 = arith.addf %11, %13 : vector<8x256xf32>
    %cst_11 = arith.constant 0.000000e+00 : f32
    %15 = vector.broadcast %cst_11 : f32 to vector<8x256xf32>
    %16 = arith.maximumf %14, %15 : vector<8x256xf32>
    %17 = arith.truncf %16 : vector<8x256xf32> to vector<8x256xbf16>
    %c0_12 = arith.constant 0 : index
    %c0_13 = arith.constant 0 : index
    %18 = vector.load %arg6[%c0_12, %c0_13] : memref<256x10xbf16, #tpu.memory_space<vmem>>, vector<256x10xbf16>
    %cst_14 = arith.constant dense<0.000000e+00> : vector<8x10xf32>
    %19 = tpu.matmul %17, %18, %cst_14 {dimension_numbers = #tpu.dot_dimension_numbers<[1], [0], [0], [1], [0, 0, 1, 1], [], []>} : vector<8x256xbf16>, vector<256x10xbf16>, vector<8x10xf32> -> vector<8x10xf32>
    %c0_15 = arith.constant 0 : index
    %c0_16 = arith.constant 0 : index
    %20 = vector.load %arg7[%c0_15, %c0_16] : memref<1x10xf32, #tpu.memory_space<vmem>>, vector<1x10xf32>
    %21 = vector.broadcast %20 : vector<1x10xf32> to vector<8x10xf32>
    %22 = arith.addf %19, %21 : vector<8x10xf32>
    %c0_17 = arith.constant 0 : index
    %c0_18 = arith.constant 0 : index
    %23 = vector.load %arg8[%c0_17, %c0_18] : memref<8x10xf32, #tpu.memory_space<vmem>>, vector<8x10xf32>
    tpu.vector_store %arg8[%c0_17, %c0_18], %22 {strides = array<i32>} : memref<8x10xf32, #tpu.memory_space<vmem>>, vector<8x10xf32>,
    return
  }
  func.func @transform_0(%arg0: i32) -> (i32, i32) {
    %c0_i32 = arith.constant 0 : i32
    %c0_i32_0 = arith.constant 0 : i32
    return %arg0, %c0_i32 : i32, i32
  }
  func.func @transform_1(%arg0: i32) -> (i32, i32) {
    %c0_i32 = arith.constant 0 : i32
    %c0_i32_0 = arith.constant 0 : i32
    %c0_i32_1 = arith.constant 0 : i32
    return %c0_i32, %c0_i32_0 : i32, i32
  }
  func.func @transform_2(%arg0: i32) -> (i32, i32) {
    %c0_i32 = arith.constant 0 : i32
    %c0_i32_0 = arith.constant 0 : i32
    %c0_i32_1 = arith.constant 0 : i32
    return %c0_i32, %c0_i32_0 : i32, i32
  }
  func.func @transform_3(%arg0: i32) -> (i32, i32) {
    %c0_i32 = arith.constant 0 : i32
    %c0_i32_0 = arith.constant 0 : i32
    %c0_i32_1 = arith.constant 0 : i32
    return %c0_i32, %c0_i32_0 : i32, i32
  }
  func.func @transform_4(%arg0: i32) -> (i32, i32) {
    %c0_i32 = arith.constant 0 : i32
    %c0_i32_0 = arith.constant 0 : i32
    %c0_i32_1 = arith.constant 0 : i32
    return %c0_i32, %c0_i32_0 : i32, i32
  }
  func.func @transform_5(%arg0: i32) -> (i32, i32) {
    %c0_i32 = arith.constant 0 : i32
    %c0_i32_0 = arith.constant 0 : i32
    %c0_i32_1 = arith.constant 0 : i32
    return %c0_i32, %c0_i32_0 : i32, i32
  }
  func.func @transform_6(%arg0: i32) -> (i32, i32) {
    %c0_i32 = arith.constant 0 : i32
    %c0_i32_0 = arith.constant 0 : i32
    %c0_i32_1 = arith.constant 0 : i32
    return %c0_i32, %c0_i32_0 : i32, i32
  }
  func.func @transform_7(%arg0: i32) -> (i32, i32) {
    %c0_i32 = arith.constant 0 : i32
    %c0_i32_0 = arith.constant 0 : i32
    return %arg0, %c0_i32 : i32, i32
  }
}

</mosaic_0001>

<bundles_post_ra>
// kernel: tpu_custom_call.1
= control target key start
LH: loop header
LB: loop body
LE: loop exit
PB: predicated region body
PF: predicated region fallthrough
CT: control target
= control target key end

     0   :  { %12 = vsyncpa [#allocation3], 0  ;;  %s1524_s0 = inlined_call_operand.hbm [shape: f32[8,784], index: 0, kind: input, shape index: {}]   ;;  %s1525_s1 = inlined_call_operand.hbm [shape: bf16[784,128], index: 1, kind: input, shape index: {}]   ;;  %s1526_s2 = inlined_call_operand.vmem [shape: f32[1,128], index: 2, kind: input, shape index: {}]   ;;  %s1527_s3 = inlined_call_operand.vmem [shape: bf16[128,256], index: 3, kind: input, shape index: {}]   ;;  %s1528_s4 = inlined_call_operand.vmem [shape: f32[1,256], index: 4, kind: input, shape index: {}]   ;;  %s1529_s5 = inlined_call_operand.vmem [shape: bf16[256,10], index: 5, kind: input, shape index: {}]   ;;  %s1530_s6 = inlined_call_operand.vmem [shape: f32[1,10], index: 6, kind: input, shape index: {}]   ;;  %s1531_s7 = inlined_call_operand.hbm [shape: f32[8,10], index: 7, kind: output, shape index: {}]  }
   0x1   :  { %13 = vsyncpa [#allocation6], 0 }
   0x2   :  { %14 = vsyncpa [#allocation4], 0  ;;  %s1328_s24 = smov [#allocation2]   ;;  %s1329_s26 = smov [#allocation5]  }
   0x3   :  { %s21_s25 = sshll.u32 %s1328_s24, 4  ;;  %s30_s27 = sshll.u32 %s1329_s26, 4  ;;  %s22_s25 = int_to_ptr.vmem [resolvable:$true] %s21_s25  ;;  %s1376_s27 = int_to_ptr.vmem [resolvable:$true] %s30_s27 }
   0x4   :  { %s1256_s30 = scalar_lea.hbm %s1524_s0, 896 }
   0x5   :  { %p1257_p0 = scmp.ne.s32.totalorder %s1524_s0, %s1256_s30  ;;  %p1260_p1 = scmp.lt.u32.totalorder %s1256_s30, %s1524_s0 }
   0x7   :  { %p1262_p2 = pnand %p1260_p1, %p1257_p0 }
   0x9   :  { %1265 = shalt.err (!%p1262_p2)
}
   0xa   :  { %s1266_s12 = scalar_lea.vmem %s22_s25, 896  ;;  %p1271_p4 = scmp.lt.s32.totalorder %s22_s25, %s22_s25 }
   0xb   :  { %p1267_p3 = scmp.ne.s32.totalorder %s22_s25, %s1266_s12  ;;  %p1272_p5 = scmp.lt.s32.totalorder %s1266_s12, %s1266_s12 }
   0xd   :  { %p1273_p6 = por %p1272_p5, %p1271_p4 }
   0xf   :  { %p1274_p7 = pnand %p1273_p6, %p1267_p3 }
  0x11   :  { %1277 = shalt.err (!%p1274_p7)
}
  0x12   :  { %24 = dma.hbm_to_vmem [thread:$0]  %s1524_s0, 896, %s22_s25, [#allocation3]  }
  0x13   :  { %s1278_s17 = scalar_lea.hbm %s1525_s1, 6272 }
  0x14   :  { %p1279_p8 = scmp.ne.s32.totalorder %s1525_s1, %s1278_s17  ;;  %p1282_p9 = scmp.lt.u32.totalorder %s1278_s17, %s1525_s1 }
  0x16   :  { %p1284_p10 = pnand %p1282_p9, %p1279_p8 }
  0x18   :  { %1287 = shalt.err (!%p1284_p10)
}
  0x19   :  { %s1288_s22 = scalar_lea.vmem %s1376_s27, 6272  ;;  %p1293_p12 = scmp.lt.s32.totalorder %s1376_s27, %s1376_s27 }
  0x1a   :  { %p1289_p11 = scmp.ne.s32.totalorder %s1376_s27, %s1288_s22  ;;  %p1294_p13 = scmp.lt.s32.totalorder %s1288_s22, %s1288_s22 }
  0x1c   :  { %p1295_p0 = por %p1294_p13, %p1293_p12 }
  0x1e   :  { %p1296_p1 = pnand %p1295_p0, %p1289_p11 }
  0x20   :  { %1299 = shalt.err (!%p1296_p1)
}
  0x21   :  { %s1330_s0 = smov 64   ;;  %s1331_s23 = smov 4  }
  0x22   :  { %36 = dma.hbm_to_vmem [thread:$0]  %s1525_s1, 6272, %s1376_s27, [#allocation6], %s1330_s0, %s1330_s0, %s1331_s23  }
  0x23   :  { %1322 = dma.done.wait [#allocation3], 896  }
  0x24   :  { %1323 = vsyncadd [#allocation3], 4294966400 }
  0x25   :  { %1324 = dma.done.wait [#allocation6], 6272  }
  0x26   :  { %1325 = vsyncadd [#allocation6], 4294961024  ;;  %v1167_v0 = vld [vmem:[#allocation5 + $0x40] sm:$0xff]   ;;  %v1171_v4 = vld [vmem:[#allocation5 + $0x48] sm:$0xff]   ;;  %v1332_v44 = vmov 0.0   ;;  %vm1333_vm0 = vmmov 0  }
  0x27   :  { %v1168_v1 = vld [vmem:[#allocation5] sm:$0xff]   ;;  %1063 = vmatprep.subr.bf16.mxu0 %v1167_v0  ;;  %v1172_v5 = vld [vmem:[#allocation5 + $0x8] sm:$0xff]   ;;  %v1175_v8 = vld [vmem:[#allocation5 + $0x50] sm:$0xff]   ;;  %vm467_vm1 = vcmask 130048   ;;  %vm961_vm2 = vcmask 80896  }
  0x28   :  { %v1169_v2 = vld [vmem:[#allocation5 + $0xc0] sm:$0xff]   ;;  %1064 = vmatpush3.bf16.msra.mxu0 %v1168_v1  ;;  %v1173_v6 = vld [vmem:[#allocation5 + $0xc8] sm:$0xff]   ;;  %v1176_v9 = vld [vmem:[#allocation5 + $0x10] sm:$0xff]  }
  0x29   :  { %v1170_v3 = vld [vmem:[#allocation5 + $0x80] sm:$0xff]   ;;  %1085 = vmatprep.subr.bf16.mxu1 %v1169_v2  ;;  %1065 = vmatprep.subr.bf16.mxu0 %v1171_v4  ;;  %v1174_v7 = vld [vmem:[#allocation5 + $0x88] sm:$0xff]   ;;  %v1177_v10 = vld [vmem:[#allocation5 + $0xd0] sm:$0xff]  }
  0x2a   :  { %1086 = vmatpush3.bf16.msra.mxu1 %v1170_v3  ;;  %v1178_v11 = vld [vmem:[#allocation5 + $0x90] sm:$0xff]   ;;  %v1179_v12 = vld [vmem:[#allocation5 + $0x58] sm:$0xff]   ;;  %v1183_v16 = vld [vmem:[#allocation5 + $0x60] sm:$0xff]  }
  0x2b   :  { %1087 = vmatprep.subr.bf16.mxu1 %v1173_v6  ;;  %v1180_v13 = vld [vmem:[#allocation5 + $0x18] sm:$0xff]   ;;  %v1184_v17 = vld [vmem:[#allocation5 + $0x20] sm:$0xff]   ;;  %v1187_v20 = vld [vmem:[#allocation5 + $0x68] sm:$0xff]  }
  0x2c   :  { %1066 = vmatpush3.bf16.msra.mxu0 %v1172_v5  ;;  %v1181_v14 = vld [vmem:[#allocation5 + $0xd8] sm:$0xff]   ;;  %v1185_v18 = vld [vmem:[#allocation5 + $0xe0] sm:$0xff]   ;;  %v1188_v21 = vld [vmem:[#allocation5 + $0x28] sm:$0xff]  }
  0x2d   :  { %1067 = vmatprep.subr.bf16.mxu0 %v1175_v8  ;;  %v1182_v15 = vld [vmem:[#allocation5 + $0x98] sm:$0xff]   ;;  %v1186_v19 = vld [vmem:[#allocation5 + $0xa0] sm:$0xff]   ;;  %v1189_v22 = vld [vmem:[#allocation5 + $0xe8] sm:$0xff]  }
  0x2e   :  { %1088 = vmatpush3.bf16.msra.mxu1 %v1174_v7  ;;  %v1190_v23 = vld [vmem:[#allocation5 + $0xa8] sm:$0xff]   ;;  %v1191_v24 = vld [vmem:[#allocation5 + $0x70] sm:$0xff]   ;;  %v1195_v28 = vld [vmem:[#allocation5 + $0x78] sm:$0xff]  }
  0x2f   :  { %1089 = vmatprep.subr.bf16.mxu1 %v1177_v10  ;;  %v1192_v25 = vld [vmem:[#allocation5 + $0x30] sm:$0xff]   ;;  %v1196_v29 = vld [vmem:[#allocation5 + $0x38] sm:$0xff]   ;;  %v54_v34 = vld [vmem:[#allocation2] sm:$0xff] }
  0x30   :  { %1068 = vmatpush3.bf16.msra.mxu0 %v1176_v9  ;;  %v1193_v26 = vld [vmem:[#allocation5 + $0xf0] sm:$0xff]   ;;  %v1197_v30 = vld [vmem:[#allocation5 + $0xf8] sm:$0xff]   ;;  %v61_v35 = vpack.c.bf16 %v54_v34, %v54_v34  ;;  %v1199_v36 = vld [vmem:[#allocation5 + $0x140] sm:$0xff]  }
  0x31   :  { %1069 = vmatprep.subr.bf16.mxu0 %v1179_v12  ;;  %v1194_v27 = vld [vmem:[#allocation5 + $0xb0] sm:$0xff]   ;;  %v1198_v33 = vld [vmem:[#allocation5 + $0xb8] sm:$0xff]   ;;  %v57_v37 = vld [vmem:[#allocation2 + $0x18] sm:$0xff] }
  0x32   :  { %1090 = vmatpush3.bf16.msra.mxu1 %v1178_v11  ;;  %v55_v31 = vld [vmem:[#allocation2 + $0x8] sm:$0xff]  ;;  %v64_v38 = vpack.c.bf16 %v57_v37, %v57_v37  ;;  %v1200_v39 = vld [vmem:[#allocation5 + $0x100] sm:$0xff]   ;;  %v56_v40 = vld [vmem:[#allocation2 + $0x10] sm:$0xff] }
  0x33   :  { %1091 = vmatprep.subr.bf16.mxu1 %v1181_v14  ;;  %v62_v32 = vpack.c.bf16 %v55_v31, %v55_v31  ;;  %v63_v41 = vpack.c.bf16 %v56_v40, %v56_v40  ;;  %v1201_v42 = vld [vmem:[#allocation5 + $0x148] sm:$0xff]   ;;  %v1203_v45 = vld [vmem:[#allocation5 + $0x150] sm:$0xff]   ;;  %v1205_v47 = vld [vmem:[#allocation5 + $0x158] sm:$0xff]  }
  0x34   :  { %1070 = vmatpush3.bf16.msra.mxu0 %v1180_v13  ;;  %543 = vmatprep.mubr.bf16.mxu1 %v64_v38  ;;  %v1202_v43 = vld [vmem:[#allocation5 + $0x108] sm:$0xff]   ;;  %v1204_v46 = vld [vmem:[#allocation5 + $0x110] sm:$0xff]   ;;  %v1206_v48 = vld [vmem:[#allocation5 + $0x118] sm:$0xff]  }
  0x35   :  { %1071 = vmatprep.subr.bf16.mxu0 %v1183_v16  ;;  %503 = vmatprep.mubr.bf16.mxu0 %v62_v32  ;;  %v1207_v49 = vld [vmem:[#allocation5 + $0x160] sm:$0xff]   ;;  %v1209_v51 = vld [vmem:[#allocation5 + $0x168] sm:$0xff]   ;;  %v59_v54 = vld [vmem:[#allocation2 + $0x28] sm:$0xff]  ;;  %v1334_v16 = vmov 0  }
  0x36   :  { %1092 = vmatpush3.bf16.msra.mxu1 %v1182_v15  ;;  %v1208_v50 = vld [vmem:[#allocation5 + $0x120] sm:$0xff]   ;;  %v1210_v52 = vld [vmem:[#allocation5 + $0x128] sm:$0xff]   ;;  %v1211_v55 = vld [vmem:[#allocation5 + $0x170] sm:$0xff]   ;;  %v66_v56 = vpack.c.bf16 %v59_v54, %v59_v54 }
  0x37   :  { %1093 = vmatprep.subr.bf16.mxu1 %v1185_v18  ;;  %v1215_v53 = vld [vmem:[#allocation5 + $0x180] sm:$0xff]   ;;  %v60_v57 = vld [vmem:[#allocation2 + $0x30] sm:$0xff]  ;;  %v1212_v59 = vld [vmem:[#allocation5 + $0x130] sm:$0xff]  }
  0x38   :  { %1072 = vmatpush3.bf16.msra.mxu0 %v1184_v17  ;;  %v67_v58 = vpack.c.bf16 %v60_v57, %v60_v57  ;;  %v1213_v60 = vld [vmem:[#allocation5 + $0x178] sm:$0xff]   ;;  %v58_v62 = vld [vmem:[#allocation2 + $0x20] sm:$0xff]  ;;  %v1254_v57 = vld [vmem:[%s1529_s5 + $0x78] sm:$0xff]  }
  0x39   :  { %1073 = vmatprep.subr.bf16.mxu0 %v1187_v20  ;;  %v1214_v61 = vld [vmem:[#allocation5 + $0x138] sm:$0xff]   ;;  %v65_v63 = vpack.c.bf16 %v58_v62, %v58_v62  ;;  %v1216_v0 = vld [vmem:[%s1527_s3] ss:$8 sps:$4 sm:$0xff]   ;;  %v1218_v1 = vld [vmem:[%s1527_s3 + $0x4] ss:$8 sps:$4 sm:$0xff]  }
  0x3a   :  { %1094 = vmatpush3.bf16.msra.mxu1 %v1186_v19  ;;  %v1221_v2 = vld [vmem:[%s1527_s3 + $0x14] ss:$8 sps:$4 sm:$0xff]   ;;  %v1219_v3 = vld [vmem:[%s1527_s3 + $0x10] ss:$8 sps:$4 sm:$0xff]   ;;  %v1224_v4 = vld [vmem:[%s1527_s3 + $0x24] ss:$8 sps:$4 sm:$0xff]  }
  0x3b   :  { %1095 = vmatprep.subr.bf16.mxu1 %v1189_v22  ;;  %v1222_v5 = vld [vmem:[%s1527_s3 + $0x20] ss:$8 sps:$4 sm:$0xff]   ;;  %v1227_v6 = vld [vmem:[%s1527_s3 + $0x34] ss:$8 sps:$4 sm:$0xff]   ;;  %v1225_v7 = vld [vmem:[%s1527_s3 + $0x30] ss:$8 sps:$4 sm:$0xff]  }
  0x3c   :  { %1074 = vmatpush3.bf16.msra.mxu0 %v1188_v21  ;;  %v1230_v8 = vld [vmem:[%s1527_s3 + $0x44] ss:$8 sps:$4 sm:$0xff]   ;;  %v1228_v9 = vld [vmem:[%s1527_s3 + $0x40] ss:$8 sps:$4 sm:$0xff]   ;;  %v1233_v10 = vld [vmem:[%s1527_s3 + $0x54] ss:$8 sps:$4 sm:$0xff]  }
  0x3d   :  { %1075 = vmatprep.subr.bf16.mxu0 %v1191_v24  ;;  %v1231_v11 = vld [vmem:[%s1527_s3 + $0x50] ss:$8 sps:$4 sm:$0xff]   ;;  %v1236_v12 = vld [vmem:[%s1527_s3 + $0x64] ss:$8 sps:$4 sm:$0xff]   ;;  %v1234_v13 = vld [vmem:[%s1527_s3 + $0x60] ss:$8 sps:$4 sm:$0xff]  }
  0x3e   :  { %1096 = vmatpush3.bf16.msra.mxu1 %v1190_v23  ;;  %v1239_v14 = vld [vmem:[%s1527_s3 + $0x74] ss:$8 sps:$4 sm:$0xff]   ;;  %v1237_v15 = vld [vmem:[%s1527_s3 + $0x70] ss:$8 sps:$4 sm:$0xff]   ;;  %v1240_v17 = vld [vmem:[%s1529_s5 + $0x40] sm:$0xff]  }
  0x3f   :  { %1097 = vmatprep.subr.bf16.mxu1 %v1193_v26  ;;  %v1241_v18 = vld [vmem:[%s1529_s5] sm:$0xff]   ;;  %v1242_v19 = vld [vmem:[%s1529_s5 + $0x48] sm:$0xff]   ;;  %v1244_v21 = vld [vmem:[%s1529_s5 + $0x50] sm:$0xff]  }
  0x40   :  { %1076 = vmatpush3.bf16.msra.mxu0 %v1192_v25  ;;  %v1243_v20 = vld [vmem:[%s1529_s5 + $0x8] sm:$0xff]   ;;  %v1245_v22 = vld [vmem:[%s1529_s5 + $0x10] sm:$0xff]   ;;  %v1246_v23 = vld [vmem:[%s1529_s5 + $0x58] sm:$0xff]  }
  0x41   :  { %1077 = vmatprep.subr.bf16.mxu0 %v1195_v28  ;;  %v1247_v24 = vld [vmem:[%s1529_s5 + $0x18] sm:$0xff]   ;;  %v1248_v25 = vld [vmem:[%s1529_s5 + $0x60] sm:$0xff]   ;;  %v1251_v28 = vld [vmem:[%s1529_s5 + $0x28] sm:$0xff]  }
  0x42   :  { %1098 = vmatpush3.bf16.msra.mxu1 %v1194_v27  ;;  %v1249_v26 = vld [vmem:[%s1529_s5 + $0x20] sm:$0xff]   ;;  %v1250_v27 = vld [vmem:[%s1529_s5 + $0x68] sm:$0xff]  }
  0x43   :  { %1099 = vmatprep.subr.bf16.mxu1 %v1197_v30  ;;  %v979_v30 = vld [vmem:[%s1526_s2] ss:$0 sm:$0xff] }
  0x44   :  { %1078 = vmatpush3.bf16.msra.mxu0 %v1196_v29  ;;  %v649_v62 = vld [vmem:[%s1528_s4] sm:$0x3]  ;;  %s1335_s4 = smov [#allocation7]  }
  0x45   :  { %1107 = vmatprep.subr.bf16.mxu0 %v1199_v36  ;;  %s969_s18 = sshll.u32 %s1335_s4, 4  ;;  %s970_s18 = int_to_ptr.vmem [resolvable:$true] %s969_s18 }
  0x46   :  { %1100 = vmatpush3.bf16.msra.mxu1 %v1198_v33  ;;  %s1300_s19 = scalar_lea.vmem %s970_s18, 128  ;;  %p1305_p3 = scmp.lt.s32.totalorder %s970_s18, %s970_s18 }
  0x47   :  { %504 = vmatmul.mubr.bf16.vlgmr.msra.gmra.mrb[0].mxu0 %v61_v35  ;;  %1153 = vmatprep.subr.bf16.mxu1 %v1332_v44  ;;  %p1301_p2 = scmp.ne.s32.totalorder %s970_s18, %s1300_s19  ;;  %p1306_p4 = scmp.lt.s32.totalorder %s1300_s19, %s1300_s19 }
  0x48   :  { %1108 = vmatpush3.bf16.msra.mxu0 %v1200_v39  ;;  %583 = vmatprep.mubr.bf16.mxu0 %v66_v56  ;;  %v1253_v56 = vld [vmem:[%s1529_s5 + $0x30] sm:$0xff]  }
  0x49   :  { %544 = vmatmul.mubr.bf16.vlgmr.msra.gmra.mrb[0].mxu1 %v63_v41  ;;  %1109 = vmatprep.subr.bf16.mxu0 %v1201_v42  ;;  %p1307_p5 = por %p1306_p4, %p1305_p3 }
  0x4a   :  { %1155 = vmatprep.mubr.msk.bf16.mxu1 %vm1333_vm0, %v1332_v44  ;;  %1154 = vmatpush3.bf16.msra.mxu1 %v1215_v53 }
  0x4b   :  { %741 = vmatprep.subr.bf16.mxu1 %v1218_v1  ;;  %p1308_p6 = pnand %p1307_p5, %p1301_p2 }
  0x4c   :  { %1110 = vmatpush3.bf16.msra.mxu0 %v1202_v43 }
  0x4d   :  { %1111 = vmatprep.subr.bf16.mxu0 %v1203_v45 }
  0x50   :  { %1112 = vmatpush3.bf16.msra.mxu0 %v1204_v46 }
  0x51   :  { %1113 = vmatprep.subr.bf16.mxu0 %v1205_v47  ;;  %1156 = vmatmul.mubr.msk.bf16.vlgmr.msra.gmra.mrb[4].mxu1 %vm467_vm1, %v67_v58  ;;  %v1255_v58 = vld [vmem:[%s1529_s5 + $0x38] sm:$0xff]  }
  0x52   :  { %742 = vmatpush1.bf16.msra.mxu1 %v1216_v0  ;;  %773 = vmatprep.mubr.bf16.mxu1 %v1334_v16 }
  0x53   :  { %743 = vmatprep.subr.bf16.mxu1 %v1221_v2 }
  0x54   :  { %1114 = vmatpush3.bf16.msra.mxu0 %v1206_v48 }
  0x55   :  { %1115 = vmatprep.subr.bf16.mxu0 %v1207_v49 }
  0x56   :  { %744 = vmatpush1.bf16.msra.mxu1 %v1219_v3 }
  0x57   :  { %745 = vmatprep.subr.bf16.mxu1 %v1224_v4 }
  0x58   :  { %1116 = vmatpush3.bf16.msra.mxu0 %v1208_v50 }
  0x59   :  { %1117 = vmatprep.subr.bf16.mxu0 %v1209_v51 }
  0x5a   :  { %746 = vmatpush1.bf16.msra.mxu1 %v1222_v5 }
  0x5b   :  { %747 = vmatprep.subr.bf16.mxu1 %v1227_v6 }
  0x5c   :  { %1118 = vmatpush3.bf16.msra.mxu0 %v1210_v52 }
  0x5d   :  { %1119 = vmatprep.subr.bf16.mxu0 %v1211_v55  ;;  %v1252_v55 = vld [vmem:[%s1529_s5 + $0x70] sm:$0xff]  }
  0x5e   :  { %748 = vmatpush1.bf16.msra.mxu1 %v1225_v7 }
  0x5f   :  { %749 = vmatprep.subr.bf16.mxu1 %v1230_v8 }
  0x60   :  { %1120 = vmatpush3.bf16.msra.mxu0 %v1212_v59  ;;  %v651_v59 = vlaneseq }
  0x61   :  { %1121 = vmatprep.subr.bf16.mxu0 %v1213_v60 }
  0x62   :  { %750 = vmatpush1.bf16.msra.mxu1 %v1228_v9  ;;  %v652_v60 = vshrl.u32 %v651_v59, 7 }
  0x63   :  { %751 = vmatprep.subr.bf16.mxu1 %v1233_v10 }
  0x64   :  { %1122 = vmatpush3.bf16.msra.mxu0 %v1214_v61  ;;  %v653_v61 = vsub.s32 0, %v652_v60 }
  0x65   :  { %1131 = vmatprep.subr.bf16.mxu0 %v1240_v17 }
  0x66   :  { %752 = vmatpush1.bf16.msra.mxu1 %v1231_v11  ;;  %v654_v0 = vrot.slane %v649_v62, %v653_v61 }
  0x67   :  { %584 = vmatmul.mubr.bf16.vlgmr.msra.gmra.mrb[4].mxu0 %v65_v63  ;;  %753 = vmatprep.subr.bf16.mxu1 %v1236_v12  ;;  %v657_v63 = vsub.s32 1, %v652_v60 }
  0x68   :  { %1132 = vmatpush3.bf16.msra.mxu0 %v1241_v18 }
  0x69   :  { %1133 = vmatprep.subr.bf16.mxu0 %v1242_v19  ;;  %v658_v1 = vrot.slane %v649_v62, %v657_v63 }
  0x6a   :  { %754 = vmatpush1.bf16.msra.mxu1 %v1234_v13  ;;  %v1046_v13 = vld [vmem:[%s1530_s6] ss:$0 sm:$0xff] }
  0x6b   :  { %755 = vmatprep.subr.bf16.mxu1 %v1239_v14 }
  0x6c   :  { %1134 = vmatpush3.bf16.msra.mxu0 %v1243_v20 }
  0x6d   :  { %1135 = vmatprep.subr.bf16.mxu0 %v1244_v21 }
  0x6e   :  { %756 = vmatpush1.bf16.msra.mxu1 %v1237_v15 }
  0x70   :  { %1136 = vmatpush3.bf16.msra.mxu0 %v1245_v22 }
  0x71   :  { %1137 = vmatprep.subr.bf16.mxu0 %v1246_v23 }
  0x74   :  { %1138 = vmatpush3.bf16.msra.mxu0 %v1247_v24 }
  0x75   :  { %1139 = vmatprep.subr.bf16.mxu0 %v1248_v25 }
  0x78   :  { %1140 = vmatpush3.bf16.msra.mxu0 %v1249_v26 }
  0x79   :  { %1141 = vmatprep.subr.bf16.mxu0 %v1250_v27 }
  0x7c   :  { %1142 = vmatpush3.bf16.msra.mxu0 %v1251_v28 }
  0x7d   :  { %1143 = vmatprep.subr.bf16.mxu0 %v1252_v55 }
  0x80   :  { %1144 = vmatpush3.bf16.msra.mxu0 %v1253_v56 }
  0x81   :  { %1145 = vmatprep.subr.bf16.mxu0 %v1254_v57 }
  0x84   :  { %1146 = vmatpush3.bf16.msra.mxu0 %v1255_v58 }
 0x11a   :  { %v1079_v29 = vpop.f32.mrb[0].mxu0 }
 0x11b   :  { %v1080_v31 = vpop.f32.mrb[1].mxu0 }
 0x11c   :  { %v1081_v32 = vadd.f32 %v1080_v31, %v1079_v29  ;;  %v1082_v33 = vpop.f32.mrb[2].mxu0  ;;  %v1101_v34 = vpop.f32.mrb[0].mxu1 }
 0x11d   :  { %v1083_v35 = vpop.f32.mrb[3].mxu0  ;;  %v1102_v37 = vpop.f32.mrb[1].mxu1 }
 0x11e   :  { %v506_v36 = vadd.f32 %v1081_v32, %v979_v30  ;;  %v1103_v38 = vadd.f32 %v1102_v37, %v1101_v34  ;;  %v1104_v39 = vpop.f32.mrb[2].mxu1 }
 0x11f   :  { %v1105_v40 = vpop.f32.mrb[3].mxu1 }
 0x120   :  { %v546_v41 = vadd.f32 %v1103_v38, %v506_v36 }
 0x124   :  { %v625_v42 = vpop.f32.mrb[4].mxu1 }
 0x125   :  { %v1157_v43 = vpop.f32.mrb[5].mxu1 }
 0x126   :  { %v628_v44 = vpop.f32.mrb[6].mxu1 }
 0x127   :  { %v1158_v45 = vpop.f32.mrb[7].mxu1 }
 0x13a   :  { %v1123_v46 = vpop.f32.mrb[4].mxu0 }
 0x13b   :  { %v1124_v47 = vpop.f32.mrb[5].mxu0 }
 0x13c   :  { %v1125_v48 = vadd.f32 %v1124_v47, %v1123_v46  ;;  %v1126_v49 = vpop.f32.mrb[6].mxu0 }
 0x13d   :  { %v1127_v50 = vpop.f32.mrb[7].mxu0 }
 0x13e   :  { %v586_v51 = vadd.f32 %v1125_v48, %v546_v41 }
 0x140   :  { %v626_v52 = vadd.f32 %v625_v42, %v586_v51 }
 0x142   :  { %v631_v53 = vmax.f32 %v626_v52, 0.0 }
 0x144   :  { %v632_v54 = vpack.c.bf16 %v631_v53, %v631_v53 }
 0x146   :  { %774 = vmatmul.mubr.bf16.vlgmr.msra.gmra.mrb[8].mxu1 %v632_v54 }
 0x219   :  { %v775_v2 = vpop.f32.mrb[8].mxu1 }
 0x21a   :  { %v776_v3 = vadd.f32 %v775_v2, %v654_v0  ;;  %v777_v4 = vpop.f32.mrb[9].mxu1 }
 0x21b   :  { %v778_v5 = vadd.f32 %v777_v4, %v658_v1  ;;  %v779_v6 = vpop.f32.mrb[10].mxu1 }
 0x21c   :  { %v782_v7 = vmax.f32 %v776_v3, 0.0  ;;  %v780_v8 = vpop.f32.mrb[11].mxu1 }
 0x21d   :  { %v783_v9 = vmax.f32 %v778_v5, 0.0 }
 0x21e   :  { %v784_v11 = vpack.c.bf16 %v782_v7, %v782_v7 }
 0x21f   :  { %v785_v10 = vpack.c.bf16 %v783_v9, %v783_v9 }
 0x221   :  { %953 = vmatprep.mubr.bf16.mxu0 %v785_v10 }
 0x222   :  { %954 = vmatmul.mubr.bf16.vlgmr.msra.gmra.mrb[8].mxu0 %v784_v11 }
 0x2f5   :  { %v1147_v12 = vpop.f32.mrb[8].mxu0 }
 0x2f6   :  { %v1148_v14 = vpop.f32.mrb[9].mxu0 }
 0x2f7   :  { %v1149_v15 = vadd.f32 %v1148_v14, %v1147_v12  ;;  %v1150_v16 = vpop.f32.mrb[10].mxu0 }
 0x2f8   :  { %v1151_v17 = vpop.f32.mrb[11].mxu0 }
 0x2f9   :  { %v956_v18 = vadd.f32 %v1149_v15, %v1046_v13 }
 0x2fb   :  { %962 = vst.msk [vmem:[#allocation7] sm:$0xff] %vm961_vm2, %v956_v18 }
 0x2fc   :  { %1311 = shalt.err (!%p1308_p6)
}
 0x2fd   :  { %s1312_s6 = scalar_lea.hbm %s1531_s7, 128 }
 0x2fe   :  { %p1313_p7 = scmp.ne.s32.totalorder %s1531_s7, %s1312_s6  ;;  %p1316_p8 = scmp.lt.u32.totalorder %s1312_s6, %s1531_s7 }
 0x300   :  { %p1318_p9 = pnand %p1316_p8, %p1313_p7 }
 0x302   :  { %1321 = shalt.err (!%p1318_p9)
}
 0x303   :  { %972 = dma.vmem_to_hbm [thread:$0]  %s970_s18, 128, %s1531_s7, [#allocation4]  }
 0x304   :  { %1326 = dma.done.wait [#allocation4], 128  }
 0x305   :  { %1327 = vsyncadd [#allocation4], 4294967168 }
 0x306   :  { %976 = vsyncpa [#allocation3], 1 }
 0x307   :  { %977 = vsyncpa [#allocation6], 1 }
 0x308   :  { %978 = vsyncpa [#allocation4], 1 }

</bundles_post_ra>
